<compile_context>
chip_gen: v5e
topology: v5e:2x2
jax: 0.10.0
libtpu: 0.0.40
codegen_flags: <defaults>
</compile_context>

<pallas_src>
import functools

import jax
import jax.numpy as jnp
import numpy as np
from jax import lax
from jax.experimental import pallas as pl
from jax.experimental.pallas import tpu as pltpu

# ALASCA hyper-parameters (defaults from the PyTorch module).
LAM = 2.0
W_EMA = 0.7
TEMP = 0.33
WARMUP_EPOCH = 30


def _vmem_capacity_bytes():
    """Per-core VMEM capacity; conservative fallback works on every generation."""
    try:
        return int(pltpu.get_tpu_info().vmem_capacity_bytes)
    except Exception:
        return 64 * 1024 * 1024        # v7x per-TC size; safe everywhere


def _choose_tiling(batch, num_classes, n_aux, itemsize):
    """Pick (tile_b, vmem_limit_bytes), generation aware.

    Budget ~75% of half the physical VMEM (the per-row formula already counts
    the 2x double buffering of the pipelined streams).
    """
    itemsize = max(int(itemsize), 1)
    vmem_limit = max(16 * 1024 * 1024, _vmem_capacity_bytes() // 2)
    budget = (vmem_limit * 3) // 4

    # VMEM bytes per batch row:
    #   double-buffered logits streams (main + aux heads, input dtype)
    # + double-buffered int32 targets
    # + two f32 EMA scratch rows (gathered + updated; single-buffered scratch).
    per_row = (2 * num_classes * itemsize * (1 + n_aux)
               + 2 * 4
               + 2 * 4 * num_classes)

    # sublane multiple for the input dtype (f32:8, bf16:16, int8/fp8:32)
    sub = 8 if itemsize >= 4 else (16 if itemsize == 2 else 32)

    if batch <= sub:
        return int(batch), int(vmem_limit)     # single full-extent block

    tile = budget // max(per_row, 1)
    tile = max(sub, min(4096, (tile // sub) * sub))

    # Keep >= 2 grid steps so both v7x TensorCores get a tile; ~0.35 us extra
    # on single-core chips, i.e. neutral there.
    half = ((pl.cdiv(batch, 2) + sub - 1) // sub) * sub
    tile = min(tile, half)
    return int(tile), int(vmem_limit)


def _make_kernel(n_aux, total_b, tile_b):
    """Builds the fused kernel for a given number of auxiliary heads."""
    needs_mask = (total_b % tile_b) != 0
    inv_b = 1.0 / float(total_b)

    def kernel(indexs_ref, w_ref, out0_ref, tgt_ref, *rest):
        # rest = (*aux_refs, ema_hbm, loss_ref, ema_out_hbm, old_buf, new_buf, sem)
        aux_refs = rest[:n_aux]
        ema_hbm = rest[n_aux]            # (num_examp, C) f32, HBM (ANY)
        loss_ref = rest[n_aux + 1]       # (1, 1, 1) per-tile partial loss
        ema_out_hbm = rest[n_aux + 2]    # aliased with ema_hbm (in-place update)
        old_buf = rest[n_aux + 3]        # VMEM (tile_b, C) f32 gathered rows
        new_buf = rest[n_aux + 4]        # VMEM (tile_b, C) f32 updated rows
        sem = rest[n_aux + 5]            # DMA semaphores (2,)

        base = pl.program_id(0) * tile_b

        def guarded(r, fn):
            if needs_mask:
                @pl.when(base + r < total_b)
                def _():
                    fn(r)
            else:
                fn(r)

        # ---- 2a) start EMA row gather (per-row DMA, indexs read from SMEM) --
        def start_gather(r):
            idx = indexs_ref[base + r]
            pltpu.make_async_copy(ema_hbm.at[pl.ds(idx, 1)],
                                  old_buf.at[pl.ds(r, 1)],
                                  sem.at[0]).start()

        @pl.loop(0, tile_b)
        def _(r):
            guarded(r, start_gather)

        out0 = out0_ref[...].astype(jnp.float32)      # (tb, C)
        tgt = tgt_ref[...]                            # (tb, 1) int32
        tb, c = out0.shape
        w = w_ref[0, 0]

        # one-hot target mask (replaces torch scatter_/gather)
        col = lax.broadcasted_iota(jnp.int32, (tb, c), 1)
        onehot = (col == tgt).astype(jnp.float32)     # (tb, C)

        if needs_mask:
            row = lax.broadcasted_iota(jnp.int32, (tb, 1), 0)
            row_valid = (row + base) < total_b

            # NOTE: jnp.where is a select, so NaN/Inf produced by garbage in
            # padded rows never reaches the loss.  Do NOT replace this with a
            # multiply-by-mask.
            def mask_rows(x):
                return jnp.where(row_valid, x, 0.0)
        else:
            def mask_rows(x):
                return x

        # ---- 1) main criterion: mean cross entropy (hidden under gather DMA)
        # ce = logsumexp(out0) - out0[target]; no full log-softmax tensor.
        m0 = jnp.max(out0, axis=-1, keepdims=True)
        lse0 = m0 + jnp.log(jnp.sum(jnp.exp(out0 - m0), axis=-1, keepdims=True))
        tgt_logit = jnp.sum(out0 * onehot, axis=-1, keepdims=True)
        ce = mask_rows(lse0 - tgt_logit)                          # (tb, 1)
        loss = jnp.sum(ce, axis=0, keepdims=True) * inv_b         # (1, 1)

        # ---- 2b) finish gather, update EMA rows ------------------------------
        def wait_gather(r):
            pltpu.make_async_copy(ema_hbm.at[pl.ds(0, 1)],
                                  old_buf.at[pl.ds(r, 1)],
                                  sem.at[0]).wait()

        @pl.loop(0, tile_b)
        def _(r):
            guarded(r, wait_gather)

        new_ema = W_EMA * old_buf[...] + (1.0 - W_EMA) * out0     # (tb, C) f32
        new_buf[...] = new_ema

        # ---- 2c) scatter updated rows back in place (aliased EMA output) ----
        # NOTE: duplicate `indexs` -> which-write-wins is unspecified, matching
        # the nondeterminism of the PyTorch in-place assignment.
        def start_scatter(r):
            idx = indexs_ref[base + r]
            pltpu.make_async_copy(new_buf.at[pl.ds(r, 1)],
                                  ema_out_hbm.at[pl.ds(idx, 1)],
                                  sem.at[1]).start()

        @pl.loop(0, tile_b)
        def _(r):
            guarded(r, start_scatter)

        # ---- 3) adaptive alpha from tempered softmax of the updated EMA -----
        scaled = new_ema * (1.0 / TEMP)
        ms = jnp.max(scaled, axis=-1, keepdims=True)
        e = jnp.exp(scaled - ms)
        denom = jnp.sum(e, axis=-1, keepdims=True)
        num = jnp.sum(e * onehot, axis=-1, keepdims=True)
        alpha = num / denom                      # exact; only (tb, 1) wide
        alpha = w * alpha + (1.0 - w)

        # smoothed target distribution (shared by every auxiliary head)
        off = (1.0 - alpha) * (1.0 / (c - 1))
        smooth_t = alpha * onehot + off * (1.0 - onehot)          # (tb, C)

        # ---- 4) auxiliary NLL losses -----------------------------------------
        # smooth_t sums to 1, so -sum(log_softmax(aux)*smooth_t)
        #   = logsumexp(aux) - sum(aux * smooth_t)   (no log-softmax tensor).
        for aux_ref in aux_refs:
            aux = aux_ref[...].astype(jnp.float32)
            ma = jnp.max(aux, axis=-1, keepdims=True)
            lse = ma + jnp.log(jnp.sum(jnp.exp(aux - ma), axis=-1, keepdims=True))
            dot = jnp.sum(aux * smooth_t, axis=-1, keepdims=True)
            per_row = mask_rows(lse - dot)                        # (tb, 1)
            loss = loss + LAM * (jnp.sum(per_row, axis=0, keepdims=True) * inv_b)

        # per-tile partial loss; summed in JAX (keeps the batch axis parallel)
        loss_ref[...] = loss[None]                                # (1, 1, 1)

        # drain the write-back DMAs before this grid step retires
        def wait_scatter(r):
            pltpu.make_async_copy(new_buf.at[pl.ds(r, 1)],
                                  ema_out_hbm.at[pl.ds(0, 1)],
                                  sem.at[1]).wait()

        @pl.loop(0, tile_b)
        def _(r):
            guarded(r, wait_scatter)

    return kernel


@functools.partial(jax.jit, donate_argnums=(4,))
def _alasca_jit(out0, aux_list, targets, indexs, ema, w):
    B, C = out0.shape
    n_aux = len(aux_list)
    num_examp = ema.shape[0]

    tgt = targets.reshape(B, 1).astype(jnp.int32)
    indexs = indexs.reshape(B).astype(jnp.int32)

    tile_b, vmem_limit = _choose_tiling(B, C, n_aux, out0.dtype.itemsize)
    num_tiles = pl.cdiv(B, tile_b)

    row_spec = pl.BlockSpec((tile_b, C), lambda i, *_: (i, 0))
    kernel = _make_kernel(n_aux, B, tile_b)

    grid_spec = pltpu.PrefetchScalarGridSpec(
        num_scalar_prefetch=1,                                   # indexs -> SMEM
        grid=(num_tiles,),
        in_specs=[
            pl.BlockSpec(memory_space=pltpu.MemorySpace.SMEM),   # w scalar
            row_spec,                                            # out0
            pl.BlockSpec((tile_b, 1), lambda i, *_: (i, 0)),     # targets
        ] + [row_spec] * n_aux                                   # aux heads
          + [pl.BlockSpec(memory_space=pl.ANY)],                 # ema table (HBM)
        out_specs=(
            pl.BlockSpec((1, 1, 1), lambda i, *_: (i, 0, 0)),    # per-tile loss
            pl.BlockSpec(memory_space=pl.ANY),                   # ema table (in place)
        ),
        scratch_shapes=[
            pltpu.VMEM((tile_b, C), jnp.float32),                # gathered rows
            pltpu.VMEM((tile_b, C), jnp.float32),                # updated rows
            pltpu.SemaphoreType.DMA((2,)),                       # gather / scatter
        ],
    )

    partial_loss, new_ema = pl.pallas_call(
        kernel,
        grid_spec=grid_spec,
        out_shape=(
            jax.ShapeDtypeStruct((num_tiles, 1, 1), jnp.float32),
            jax.ShapeDtypeStruct((num_examp, C), jnp.float32),
        ),
        # flat operands: indexs=0, w=1, out0=2, tgt=3, aux=4..3+n_aux, ema=4+n_aux
        input_output_aliases={4 + n_aux: 1},
        compiler_params=pltpu.CompilerParams(
            dimension_semantics=("parallel",),
            vmem_limit_bytes=vmem_limit,
        ),
    )(indexs, w, out0, tgt, *aux_list, ema)

    return jnp.sum(partial_loss), new_ema


def alasca_forward(outputs, targets, epoch, indexs, ema):
    """ALASCA.forward(outputs, targets, epoch, indexs, update=None).

    outputs : list of (B, C) logits; outputs[0] main head, rest auxiliary.
              Any float dtype (bf16 is DMA'd as-is and cast in-kernel).
    targets : (B,) int labels.
    epoch   : python/int scalar.
    indexs  : (B,) int indices into the EMA table.
    ema     : (num_examp, C) f32 EMA state; its buffer is DONATED and updated
              in place via the aliased kernel output — do not reuse the input
              array afterwards.
    Returns (loss_scalar, new_ema).
    """
    out0 = outputs[0]
    aux_list = list(outputs[1:])       # zero auxiliary heads is handled
    w = jnp.minimum(1.0, jnp.float32(epoch) / WARMUP_EPOCH).reshape(1, 1)
    loss, new_ema = _alasca_jit(out0, aux_list, targets.astype(jnp.int32),
                                indexs.astype(jnp.int32), ema, w)
    return loss, new_ema


# ---------------------------- pure-JAX reference ----------------------------
def _reference(outputs, targets, epoch, indexs, ema):
    out0 = outputs[0].astype(jnp.float32)
    C = out0.shape[1]
    onehot = jax.nn.one_hot(targets, C, dtype=jnp.float32)
    logp0 = jax.nn.log_softmax(out0, axis=-1)
    loss = -jnp.mean(jnp.sum(onehot * logp0, axis=-1))
    ema_rows = W_EMA * ema[indexs] + (1.0 - W_EMA) * out0
    new_ema = ema.at[indexs].set(ema_rows)
    sm = jax.nn.softmax(ema_rows / TEMP, axis=-1)
    alpha = jnp.take_along_axis(sm, targets[:, None], axis=1)
    wgt = min(1.0, epoch / WARMUP_EPOCH)
    alpha = wgt * alpha + (1.0 - wgt)
    smooth_t = alpha * onehot + (1.0 - alpha) / (C - 1) * (1.0 - onehot)
    for o in outputs[1:]:
        logp = jax.nn.log_softmax(o.astype(jnp.float32), axis=-1)
        loss = loss + LAM * (-jnp.mean(jnp.sum(logp * smooth_t, axis=-1)))
    return loss, new_ema


if __name__ == "__main__":
    key = jax.random.PRNGKey(0)
    B, C, A = 16, 128, 2        # batch, classes, number of auxiliary heads
    NUM_EXAMP = 64
    k1, k2, k3, k4, k5 = jax.random.split(key, 5)

    out_main = jax.random.normal(k1, (B, C), jnp.float32)
    out_aux1 = jax.random.normal(k2, (B, C), jnp.float32)
    out_aux2 = jax.random.normal(k3, (B, C), jnp.float32)
    targets = jax.random.randint(k4, (B,), 0, C, dtype=jnp.int32)
    indexs = jax.random.permutation(k5, NUM_EXAMP)[:B].astype(jnp.int32)
    ema_state = jnp.zeros((NUM_EXAMP, C), jnp.float32)   # torch.zeros(...) init
    epoch = 10

    outputs = [out_main, out_aux1, out_aux2]

    # Reference first (ema_state's buffer is donated by the kernel call).
    ref_loss, ref_ema = _reference(outputs, targets, epoch, indexs, ema_state)
    ref_loss, ref_ema = jax.block_until_ready((ref_loss, ref_ema))

    loss, new_ema_state = alasca_forward(outputs, targets, epoch, indexs, ema_state)
    loss, new_ema_state = jax.block_until_ready((loss, new_ema_state))

    np.testing.assert_allclose(np.asarray(loss), np.asarray(ref_loss),
                               rtol=1e-3, atol=1e-3)
    np.testing.assert_allclose(np.asarray(new_ema_state), np.asarray(ref_ema),
                               rtol=1e-5, atol=1e-5)
    print("KERNEL_OK")
</pallas_src>

<mosaic_0001>
module attributes {stable_mosaic.version = 11 : i64} {
  func.func @kernel(%arg0: i32, %arg1: memref<16xi32, #tpu.memory_space<smem>>, %arg2: memref<1x1xf32, #tpu.memory_space<smem>>, %arg3: memref<8x128xf32, #tpu.memory_space<vmem>>, %arg4: memref<8x1xi32, #tpu.memory_space<vmem>>, %arg5: memref<8x128xf32, #tpu.memory_space<vmem>>, %arg6: memref<8x128xf32, #tpu.memory_space<vmem>>, %arg7: memref<64x128xf32, #tpu.memory_space<any>>, %arg8: memref<1x1x1xf32, #tpu.memory_space<vmem>>, %arg9: memref<64x128xf32, #tpu.memory_space<any>>, %arg10: memref<8x128xf32, #tpu.memory_space<vmem>>, %arg11: memref<8x128xf32, #tpu.memory_space<vmem>>, %arg12: memref<2x!tpu.dma_semaphore, #tpu.memory_space<semaphore_mem>>) attributes {dimension_semantics = [#tpu.dimension_semantics<parallel>], iteration_bounds = array<i64: 2>, scalar_prefetch = 1 : i64, scratch_operands = 3 : i64, tpu.core_type = #tpu.core_type<tc>, window_params = [{transform_indices = @transform_0, window_bounds = array<i64: 1, 1>}, {transform_indices = @transform_1, window_bounds = array<i64: 8, 128>}, {transform_indices = @transform_2, window_bounds = array<i64: 8, 1>}, {transform_indices = @transform_3, window_bounds = array<i64: 8, 128>}, {transform_indices = @transform_4, window_bounds = array<i64: 8, 128>}, {}, {transform_indices = @transform_6, window_bounds = array<i64: 1, 1, 1>}, {}]} {
    %c8_i32 = arith.constant 8 : i32
    %0 = arith.muli %arg0, %c8_i32 : i32
    %c0_i32 = arith.constant 0 : i32
    %c8_i32_0 = arith.constant 8 : i32
    %1 = arith.addi %c0_i32, %c8_i32_0 : i32
    %c1_i32 = arith.constant 1 : i32
    scf.for %arg13 = %c0_i32 to %1 step %c1_i32  : i32 {
      %c1_i32_56 = arith.constant 1 : i32
      %110 = arith.muli %arg13, %c1_i32_56 : i32
      %c0_i32_57 = arith.constant 0 : i32
      %111 = arith.addi %c0_i32_57, %110 : i32
      %112 = arith.addi %0, %111 : i32
      %113 = arith.index_cast %112 : i32 to index
      %114 = memref.load %arg1[%113] : memref<16xi32, #tpu.memory_space<smem>>
      %c0_i32_58 = arith.constant 0 : i32
      %c0_i32_59 = arith.constant 0 : i32
      %115 = tpu.memref_slice %arg7[%114, %c0_i32_59] : memref<64x128xf32, #tpu.memory_space<any>> -> memref<1x128xf32, #tpu.memory_space<any>>
      %c0_i32_60 = arith.constant 0 : i32
      %116 = tpu.memref_slice %arg10[%111, %c0_i32_60] : memref<8x128xf32, #tpu.memory_space<vmem>> -> memref<1x128xf32, #tpu.memory_space<vmem>>
      %117 = tpu.memref_slice %arg12[%c0_i32_58] : memref<2x!tpu.dma_semaphore, #tpu.memory_space<semaphore_mem>> -> memref<1x!tpu.dma_semaphore, #tpu.memory_space<semaphore_mem>>
      %118 = tpu.memref_squeeze %117 : memref<1x!tpu.dma_semaphore, #tpu.memory_space<semaphore_mem>> -> memref<!tpu.dma_semaphore, #tpu.memory_space<semaphore_mem>>
      tpu.enqueue_dma source(%115 : memref<1x128xf32, #tpu.memory_space<any>>) target(%116 : memref<1x128xf32, #tpu.memory_space<vmem>>) target_semaphore(%118 : memref<!tpu.dma_semaphore, #tpu.memory_space<semaphore_mem>>)
    }
    %c8_i32_1 = arith.constant 8 : i32
    %c0 = arith.constant 0 : index
    %c0_2 = arith.constant 0 : index
    %2 = vector.load %arg3[%c0, %c0_2] : memref<8x128xf32, #tpu.memory_space<vmem>>, vector<8x128xf32>
    %c0_3 = arith.constant 0 : index
    %c0_4 = arith.constant 0 : index
    %3 = vector.load %arg4[%c0_3, %c0_4] : memref<8x1xi32, #tpu.memory_space<vmem>>, vector<8x1xi32>
    %c0_5 = arith.constant 0 : index
    %c0_6 = arith.constant 0 : index
    %4 = memref.load %arg2[%c0_5, %c0_6] : memref<1x1xf32, #tpu.memory_space<smem>>
    %5 = tpu.iota {dimensions = array<i32: 1>} : vector<8x128xi32>
    %6 = vector.broadcast %3 : vector<8x1xi32> to vector<8x128xi32>
    %7 = arith.cmpi eq, %5, %6 : vector<8x128xi32>
    %8 = arith.extui %7 : vector<8x128xi1> to vector<8x128xi32>
    %9 = arith.sitofp %8 : vector<8x128xi32> to vector<8x128xf32>
    %cst = arith.constant dense<0xFF800000> : vector<8xf32>
    %10 = vector.multi_reduction <maximumf>, %2, %cst [1] : vector<8x128xf32> to vector<8xf32>
    %11 = vector.shape_cast %10 : vector<8xf32> to vector<8x1xf32>
    %12 = vector.broadcast %11 : vector<8x1xf32> to vector<8x128xf32>
    %13 = arith.subf %2, %12 : vector<8x128xf32>
    %14 = math.exp %13 : vector<8x128xf32>
    %cst_7 = arith.constant dense<0.000000e+00> : vector<8xf32>
    %15 = vector.multi_reduction <add>, %14, %cst_7 [1] : vector<8x128xf32> to vector<8xf32>
    %16 = vector.shape_cast %15 : vector<8xf32> to vector<8x1xf32>
    %17 = math.log %16 : vector<8x1xf32>
    %18 = arith.addf %11, %17 : vector<8x1xf32>
    %19 = arith.mulf %2, %9 : vector<8x128xf32>
    %cst_8 = arith.constant dense<0.000000e+00> : vector<8xf32>
    %20 = vector.multi_reduction <add>, %19, %cst_8 [1] : vector<8x128xf32> to vector<8xf32>
    %21 = vector.shape_cast %20 : vector<8xf32> to vector<8x1xf32>
    %22 = arith.subf %18, %21 : vector<8x1xf32>
    %cst_9 = arith.constant dense<0.000000e+00> : vector<1xf32>
    %23 = vector.multi_reduction <add>, %22, %cst_9 [0] : vector<8x1xf32> to vector<1xf32>
    %24 = vector.shape_cast %23 : vector<1xf32> to vector<1x1xf32>
    %cst_10 = arith.constant 6.250000e-02 : f32
    %25 = vector.broadcast %cst_10 : f32 to vector<1x1xf32>
    %26 = arith.mulf %24, %25 : vector<1x1xf32>
    %c0_i32_11 = arith.constant 0 : i32
    %c8_i32_12 = arith.constant 8 : i32
    %27 = arith.addi %c0_i32_11, %c8_i32_12 : i32
    %c1_i32_13 = arith.constant 1 : i32
    scf.for %arg13 = %c0_i32_11 to %27 step %c1_i32_13  : i32 {
      %c1_i32_56 = arith.constant 1 : i32
      %110 = arith.muli %arg13, %c1_i32_56 : i32
      %c0_i32_57 = arith.constant 0 : i32
      %111 = arith.addi %c0_i32_57, %110 : i32
      %c0_i32_58 = arith.constant 0 : i32
      %c0_i32_59 = arith.constant 0 : i32
      %c0_i32_60 = arith.constant 0 : i32
      %112 = tpu.memref_slice %arg7[%c0_i32_59, %c0_i32_60] : memref<64x128xf32, #tpu.memory_space<any>> -> memref<1x128xf32, #tpu.memory_space<any>>
      %c0_i32_61 = arith.constant 0 : i32
      %113 = tpu.memref_slice %arg10[%111, %c0_i32_61] : memref<8x128xf32, #tpu.memory_space<vmem>> -> memref<1x128xf32, #tpu.memory_space<vmem>>
      %114 = tpu.memref_slice %arg12[%c0_i32_58] : memref<2x!tpu.dma_semaphore, #tpu.memory_space<semaphore_mem>> -> memref<1x!tpu.dma_semaphore, #tpu.memory_space<semaphore_mem>>
      %115 = tpu.memref_squeeze %114 : memref<1x!tpu.dma_semaphore, #tpu.memory_space<semaphore_mem>> -> memref<!tpu.dma_semaphore, #tpu.memory_space<semaphore_mem>>
      tpu.wait_dma2 semaphore(%115 : memref<!tpu.dma_semaphore, #tpu.memory_space<semaphore_mem>>) src(%112 : memref<1x128xf32, #tpu.memory_space<any>>) dst(%113 : memref<1x128xf32, #tpu.memory_space<vmem>>)
    }
    %c8_i32_14 = arith.constant 8 : i32
    %c0_15 = arith.constant 0 : index
    %c0_16 = arith.constant 0 : index
    %28 = vector.load %arg10[%c0_15, %c0_16] : memref<8x128xf32, #tpu.memory_space<vmem>>, vector<8x128xf32>
    %cst_17 = arith.constant 0.699999988 : f32
    %29 = vector.broadcast %cst_17 : f32 to vector<8x128xf32>
    %30 = arith.mulf %29, %28 : vector<8x128xf32>
    %cst_18 = arith.constant 3.000000e-01 : f32
    %31 = vector.broadcast %cst_18 : f32 to vector<8x128xf32>
    %32 = arith.mulf %31, %2 : vector<8x128xf32>
    %33 = arith.addf %30, %32 : vector<8x128xf32>
    %c0_19 = arith.constant 0 : index
    %c0_20 = arith.constant 0 : index
    %34 = vector.load %arg11[%c0_19, %c0_20] : memref<8x128xf32, #tpu.memory_space<vmem>>, vector<8x128xf32>
    tpu.vector_store %arg11[%c0_19, %c0_20], %33 {strides = array<i32>} : memref<8x128xf32, #tpu.memory_space<vmem>>, vector<8x128xf32>,
    %c0_i32_21 = arith.constant 0 : i32
    %c8_i32_22 = arith.constant 8 : i32
    %35 = arith.addi %c0_i32_21, %c8_i32_22 : i32
    %c1_i32_23 = arith.constant 1 : i32
    scf.for %arg13 = %c0_i32_21 to %35 step %c1_i32_23  : i32 {
      %c1_i32_56 = arith.constant 1 : i32
      %110 = arith.muli %arg13, %c1_i32_56 : i32
      %c0_i32_57 = arith.constant 0 : i32
      %111 = arith.addi %c0_i32_57, %110 : i32
      %112 = arith.addi %0, %111 : i32
      %113 = arith.index_cast %112 : i32 to index
      %114 = memref.load %arg1[%113] : memref<16xi32, #tpu.memory_space<smem>>
      %c1_i32_58 = arith.constant 1 : i32
      %c0_i32_59 = arith.constant 0 : i32
      %115 = tpu.memref_slice %arg11[%111, %c0_i32_59] : memref<8x128xf32, #tpu.memory_space<vmem>> -> memref<1x128xf32, #tpu.memory_space<vmem>>
      %c0_i32_60 = arith.constant 0 : i32
      %116 = tpu.memref_slice %arg9[%114, %c0_i32_60] : memref<64x128xf32, #tpu.memory_space<any>> -> memref<1x128xf32, #tpu.memory_space<any>>
      %117 = tpu.memref_slice %arg12[%c1_i32_58] : memref<2x!tpu.dma_semaphore, #tpu.memory_space<semaphore_mem>> -> memref<1x!tpu.dma_semaphore, #tpu.memory_space<semaphore_mem>>
      %118 = tpu.memref_squeeze %117 : memref<1x!tpu.dma_semaphore, #tpu.memory_space<semaphore_mem>> -> memref<!tpu.dma_semaphore, #tpu.memory_space<semaphore_mem>>
      tpu.enqueue_dma source(%115 : memref<1x128xf32, #tpu.memory_space<vmem>>) target(%116 : memref<1x128xf32, #tpu.memory_space<any>>) target_semaphore(%118 : memref<!tpu.dma_semaphore, #tpu.memory_space<semaphore_mem>>)
    }
    %c8_i32_24 = arith.constant 8 : i32
    %cst_25 = arith.constant 3.030303 : f32
    %36 = vector.broadcast %cst_25 : f32 to vector<8x128xf32>
    %37 = arith.mulf %33, %36 : vector<8x128xf32>
    %cst_26 = arith.constant dense<0xFF800000> : vector<8xf32>
    %38 = vector.multi_reduction <maximumf>, %37, %cst_26 [1] : vector<8x128xf32> to vector<8xf32>
    %39 = vector.shape_cast %38 : vector<8xf32> to vector<8x1xf32>
    %40 = vector.broadcast %39 : vector<8x1xf32> to vector<8x128xf32>
    %41 = arith.subf %37, %40 : vector<8x128xf32>
    %42 = math.exp %41 : vector<8x128xf32>
    %cst_27 = arith.constant dense<0.000000e+00> : vector<8xf32>
    %43 = vector.multi_reduction <add>, %42, %cst_27 [1] : vector<8x128xf32> to vector<8xf32>
    %44 = vector.shape_cast %43 : vector<8xf32> to vector<8x1xf32>
    %45 = arith.mulf %42, %9 : vector<8x128xf32>
    %cst_28 = arith.constant dense<0.000000e+00> : vector<8xf32>
    %46 = vector.multi_reduction <add>, %45, %cst_28 [1] : vector<8x128xf32> to vector<8xf32>
    %47 = vector.shape_cast %46 : vector<8xf32> to vector<8x1xf32>
    %48 = arith.divf %47, %44 : vector<8x1xf32>
    %49 = vector.broadcast %4 : f32 to vector<8x1xf32>
    %50 = arith.mulf %49, %48 : vector<8x1xf32>
    %cst_29 = arith.constant 1.000000e+00 : f32
    %51 = arith.subf %cst_29, %4 : f32
    %52 = vector.broadcast %51 : f32 to vector<8x1xf32>
    %53 = arith.addf %50, %52 : vector<8x1xf32>
    %cst_30 = arith.constant 1.000000e+00 : f32
    %54 = vector.broadcast %cst_30 : f32 to vector<8x1xf32>
    %55 = arith.subf %54, %53 : vector<8x1xf32>
    %cst_31 = arith.constant 0.00787401571 : f32
    %56 = vector.broadcast %cst_31 : f32 to vector<8x1xf32>
    %57 = arith.mulf %55, %56 : vector<8x1xf32>
    %58 = vector.broadcast %53 : vector<8x1xf32> to vector<8x128xf32>
    %59 = arith.mulf %58, %9 : vector<8x128xf32>
    %cst_32 = arith.constant 1.000000e+00 : f32
    %60 = vector.broadcast %cst_32 : f32 to vector<8x128xf32>
    %61 = arith.subf %60, %9 : vector<8x128xf32>
    %62 = vector.broadcast %57 : vector<8x1xf32> to vector<8x128xf32>
    %63 = arith.mulf %62, %61 : vector<8x128xf32>
    %64 = arith.addf %59, %63 : vector<8x128xf32>
    %c0_33 = arith.constant 0 : index
    %c0_34 = arith.constant 0 : index
    %65 = vector.load %arg5[%c0_33, %c0_34] : memref<8x128xf32, #tpu.memory_space<vmem>>, vector<8x128xf32>
    %cst_35 = arith.constant dense<0xFF800000> : vector<8xf32>
    %66 = vector.multi_reduction <maximumf>, %65, %cst_35 [1] : vector<8x128xf32> to vector<8xf32>
    %67 = vector.shape_cast %66 : vector<8xf32> to vector<8x1xf32>
    %68 = vector.broadcast %67 : vector<8x1xf32> to vector<8x128xf32>
    %69 = arith.subf %65, %68 : vector<8x128xf32>
    %70 = math.exp %69 : vector<8x128xf32>
    %cst_36 = arith.constant dense<0.000000e+00> : vector<8xf32>
    %71 = vector.multi_reduction <add>, %70, %cst_36 [1] : vector<8x128xf32> to vector<8xf32>
    %72 = vector.shape_cast %71 : vector<8xf32> to vector<8x1xf32>
    %73 = math.log %72 : vector<8x1xf32>
    %74 = arith.addf %67, %73 : vector<8x1xf32>
    %75 = arith.mulf %65, %64 : vector<8x128xf32>
    %cst_37 = arith.constant dense<0.000000e+00> : vector<8xf32>
    %76 = vector.multi_reduction <add>, %75, %cst_37 [1] : vector<8x128xf32> to vector<8xf32>
    %77 = vector.shape_cast %76 : vector<8xf32> to vector<8x1xf32>
    %78 = arith.subf %74, %77 : vector<8x1xf32>
    %cst_38 = arith.constant dense<0.000000e+00> : vector<1xf32>
    %79 = vector.multi_reduction <add>, %78, %cst_38 [0] : vector<8x1xf32> to vector<1xf32>
    %80 = vector.shape_cast %79 : vector<1xf32> to vector<1x1xf32>
    %cst_39 = arith.constant 6.250000e-02 : f32
    %81 = vector.broadcast %cst_39 : f32 to vector<1x1xf32>
    %82 = arith.mulf %80, %81 : vector<1x1xf32>
    %cst_40 = arith.constant 2.000000e+00 : f32
    %83 = vector.broadcast %cst_40 : f32 to vector<1x1xf32>
    %84 = arith.mulf %83, %82 : vector<1x1xf32>
    %85 = arith.addf %26, %84 : vector<1x1xf32>
    %c0_41 = arith.constant 0 : index
    %c0_42 = arith.constant 0 : index
    %86 = vector.load %arg6[%c0_41, %c0_42] : memref<8x128xf32, #tpu.memory_space<vmem>>, vector<8x128xf32>
    %cst_43 = arith.constant dense<0xFF800000> : vector<8xf32>
    %87 = vector.multi_reduction <maximumf>, %86, %cst_43 [1] : vector<8x128xf32> to vector<8xf32>
    %88 = vector.shape_cast %87 : vector<8xf32> to vector<8x1xf32>
    %89 = vector.broadcast %88 : vector<8x1xf32> to vector<8x128xf32>
    %90 = arith.subf %86, %89 : vector<8x128xf32>
    %91 = math.exp %90 : vector<8x128xf32>
    %cst_44 = arith.constant dense<0.000000e+00> : vector<8xf32>
    %92 = vector.multi_reduction <add>, %91, %cst_44 [1] : vector<8x128xf32> to vector<8xf32>
    %93 = vector.shape_cast %92 : vector<8xf32> to vector<8x1xf32>
    %94 = math.log %93 : vector<8x1xf32>
    %95 = arith.addf %88, %94 : vector<8x1xf32>
    %96 = arith.mulf %86, %64 : vector<8x128xf32>
    %cst_45 = arith.constant dense<0.000000e+00> : vector<8xf32>
    %97 = vector.multi_reduction <add>, %96, %cst_45 [1] : vector<8x128xf32> to vector<8xf32>
    %98 = vector.shape_cast %97 : vector<8xf32> to vector<8x1xf32>
    %99 = arith.subf %95, %98 : vector<8x1xf32>
    %cst_46 = arith.constant dense<0.000000e+00> : vector<1xf32>
    %100 = vector.multi_reduction <add>, %99, %cst_46 [0] : vector<8x1xf32> to vector<1xf32>
    %101 = vector.shape_cast %100 : vector<1xf32> to vector<1x1xf32>
    %cst_47 = arith.constant 6.250000e-02 : f32
    %102 = vector.broadcast %cst_47 : f32 to vector<1x1xf32>
    %103 = arith.mulf %101, %102 : vector<1x1xf32>
    %cst_48 = arith.constant 2.000000e+00 : f32
    %104 = vector.broadcast %cst_48 : f32 to vector<1x1xf32>
    %105 = arith.mulf %104, %103 : vector<1x1xf32>
    %106 = arith.addf %85, %105 : vector<1x1xf32>
    %107 = vector.shape_cast %106 : vector<1x1xf32> to vector<1x1x1xf32>
    %c0_49 = arith.constant 0 : index
    %c0_50 = arith.constant 0 : index
    %c0_51 = arith.constant 0 : index
    %108 = vector.load %arg8[%c0_49, %c0_50, %c0_51] : memref<1x1x1xf32, #tpu.memory_space<vmem>>, vector<1x1x1xf32>
    tpu.vector_store %arg8[%c0_49, %c0_50, %c0_51], %107 {strides = array<i32>} : memref<1x1x1xf32, #tpu.memory_space<vmem>>, vector<1x1x1xf32>,
    %c0_i32_52 = arith.constant 0 : i32
    %c8_i32_53 = arith.constant 8 : i32
    %109 = arith.addi %c0_i32_52, %c8_i32_53 : i32
    %c1_i32_54 = arith.constant 1 : i32
    scf.for %arg13 = %c0_i32_52 to %109 step %c1_i32_54  : i32 {
      %c1_i32_56 = arith.constant 1 : i32
      %110 = arith.muli %arg13, %c1_i32_56 : i32
      %c0_i32_57 = arith.constant 0 : i32
      %111 = arith.addi %c0_i32_57, %110 : i32
      %c1_i32_58 = arith.constant 1 : i32
      %c0_i32_59 = arith.constant 0 : i32
      %112 = tpu.memref_slice %arg11[%111, %c0_i32_59] : memref<8x128xf32, #tpu.memory_space<vmem>> -> memref<1x128xf32, #tpu.memory_space<vmem>>
      %c0_i32_60 = arith.constant 0 : i32
      %c0_i32_61 = arith.constant 0 : i32
      %113 = tpu.memref_slice %arg9[%c0_i32_60, %c0_i32_61] : memref<64x128xf32, #tpu.memory_space<any>> -> memref<1x128xf32, #tpu.memory_space<any>>
      %114 = tpu.memref_slice %arg12[%c1_i32_58] : memref<2x!tpu.dma_semaphore, #tpu.memory_space<semaphore_mem>> -> memref<1x!tpu.dma_semaphore, #tpu.memory_space<semaphore_mem>>
      %115 = tpu.memref_squeeze %114 : memref<1x!tpu.dma_semaphore, #tpu.memory_space<semaphore_mem>> -> memref<!tpu.dma_semaphore, #tpu.memory_space<semaphore_mem>>
      tpu.wait_dma2 semaphore(%115 : memref<!tpu.dma_semaphore, #tpu.memory_space<semaphore_mem>>) src(%112 : memref<1x128xf32, #tpu.memory_space<vmem>>) dst(%113 : memref<1x128xf32, #tpu.memory_space<any>>)
    }
    %c8_i32_55 = arith.constant 8 : i32
    return
  }
  func.func @transform_0(%arg0: i32, %arg1: memref<16xi32, #tpu.memory_space<smem>>) -> (i32, i32) {
    %c0_i32 = arith.constant 0 : i32
    %c0_i32_0 = arith.constant 0 : i32
    %c0_i32_1 = arith.constant 0 : i32
    return %c0_i32, %c0_i32_0 : i32, i32
  }
  func.func @transform_1(%arg0: i32, %arg1: memref<16xi32, #tpu.memory_space<smem>>) -> (i32, i32) {
    %c0_i32 = arith.constant 0 : i32
    %c0_i32_0 = arith.constant 0 : i32
    return %arg0, %c0_i32 : i32, i32
  }
  func.func @transform_2(%arg0: i32, %arg1: memref<16xi32, #tpu.memory_space<smem>>) -> (i32, i32) {
    %c0_i32 = arith.constant 0 : i32
    %c0_i32_0 = arith.constant 0 : i32
    return %arg0, %c0_i32 : i32, i32
  }
  func.func @transform_3(%arg0: i32, %arg1: memref<16xi32, #tpu.memory_space<smem>>) -> (i32, i32) {
    %c0_i32 = arith.constant 0 : i32
    %c0_i32_0 = arith.constant 0 : i32
    return %arg0, %c0_i32 : i32, i32
  }
  func.func @transform_4(%arg0: i32, %arg1: memref<16xi32, #tpu.memory_space<smem>>) -> (i32, i32) {
    %c0_i32 = arith.constant 0 : i32
    %c0_i32_0 = arith.constant 0 : i32
    return %arg0, %c0_i32 : i32, i32
  }
  func.func @transform_6(%arg0: i32, %arg1: memref<16xi32, #tpu.memory_space<smem>>) -> (i32, i32, i32) {
    %c0_i32 = arith.constant 0 : i32
    %c0_i32_0 = arith.constant 0 : i32
    %c0_i32_1 = arith.constant 0 : i32
    return %arg0, %c0_i32, %c0_i32_0 : i32, i32, i32
  }
}

</mosaic_0001>

<bundles_post_ra>
// kernel: _alasca_jit.1
= control target key start
LH: loop header
LB: loop body
LE: loop exit
PB: predicated region body
PF: predicated region fallthrough
CT: control target
= control target key end

     0   :  { %s972_s10 = smov [#allocation6]   ;;  %s1237_s0 = inlined_call_operand.vmem [shape: s32[16], index: 0, kind: input, shape index: {}]   ;;  %s1238_s1 = inlined_call_operand.<no memory space> [shape: f32[1,1], index: 1, kind: input, shape index: {}]   ;;  %s1239_s2 = inlined_call_operand.vmem [shape: f32[16,128], index: 2, kind: input, shape index: {}]   ;;  %s1240_s3 = inlined_call_operand.vmem [shape: s32[16,1], index: 3, kind: input, shape index: {}]   ;;  %s1241_s4 = inlined_call_operand.hbm [shape: f32[16,128], index: 4, kind: input, shape index: {}]   ;;  %s1242_s5 = inlined_call_operand.hbm [shape: f32[16,128], index: 5, kind: input, shape index: {}]   ;;  %s1243_s6 = inlined_call_operand.hbm [shape: f32[64,128], index: 6, kind: input, shape index: {}, may-alias: {6,8}]   ;;  %s1244_s7 = inlined_call_operand.vmem [shape: f32[2,1,1], index: 7, kind: output, shape index: {0}]   ;;  %s1245_s8 = inlined_call_operand.hbm [shape: f32[64,128], index: 8, kind: output, shape index: {1}, may-alias: {6,8}]  }
   0x1   :  { %1246 = sst [smem:[#allocation23_spill]] %s1239_s2  ;;  %s15_s29 = sshll.u32 %s1237_s0, 4  ;;  %s16_s29 = int_to_ptr.vmem [resolvable:$true] %s15_s29 }
   0x2   :  { %1247 = sst [smem:[#allocation24_spill]] %s1240_s3 }
   0x3   :  { %19 = sst [smem:[#allocation7]] %s1238_s1 }
   0x4   :  { %18 = dma.vmem_to_smem %s16_s29, 16, %s972_s10, [#allocation5] }
   0x5   :  { %926 = dma.done.wait [#allocation5], 16 }
   0x6   :  { %927 = vsyncadd [#allocation5], 4294967280 }
   0x7   :  { %22 = sfence }
   0x8   :  { %23 = vsyncpa [#allocation9], 0 }
   0x9   :  { %25 = vsyncpa [#allocation9 + $0x1], 0 }
   0xa   :  { %26 = vsyncpa [#allocation11], 0 }
   0xb   :  { %28 = vsyncpa [#allocation11 + $0x1], 0  ;;  %s1028_s11 = smov 0   ;;  %s1030_s12 = smov 0  }
   0xc   :  { %s1032_s13 = smov 0   ;;  %s1034_s0 = smov 0  }
   0xd LB: > { %s1047_s1 = sadd.s32 4294967295, %s954_s0   ;;  %s1050_s14 = sadd.s32 1, %s954_s0   ;;  %s954_s0 = sphi %s1034_s0, %s1260_s0   ;;  %s950_s13 = sphi %s1032_s13, %s1259_s13   ;;  %s946_s12 = sphi %s1030_s12, %s1258_s12   ;;  %s942_s11 = sphi %s1028_s11, %s1257_s11  }
   0xe   : > { %s111_s15 = ssub.s32 %s954_s0, %s1050_s14  ;;  %s114_s16 = sadd.s32 1, %s950_s13 }
   0xf   : > { %p112_p0 = scmp.eq.s32.totalorder %s111_s15, 0  ;;  %p121_p1 = scmp.ne.s32.totalorder %s950_s13, %s946_s12 }
  0x10   : > { %p122_p2 = scmp.eq.s32.totalorder %s954_s0, 0  ;;  %p127_p3 = scmp.ne.s32.totalorder %s946_s12, %s942_s11 }
  0x11   : > { %s1060_s17 = scalar_select %p112_p0, %s950_s13, %s114_s16  }
  0x12   : > { %p1062_p4 = por %p122_p2, %p121_p1  ;;  %p128_p5 = scmp.eq.s32.totalorder %s1047_s1, 0 }
  0x13   : > { %p689_p6 = scmp.lt.s32.totalorder %s954_s0, 2  ;;  %s1073_s20 = sand.u32 1, %s950_s13  }
  0x14   : > { %p1068_p7 = por %p128_p5, %p127_p3  ;;  %s663_s21 = sshll.u32 %s1073_s20, 3 }
  0x15   : > { %s664_s22 = sshll.u32 %s954_s0, 3  ;;  %s224_s26 = scalar_lea.vmem [#allocation8], %s663_s21 }
  0x16   : > { %s228_s25 = scalar_lea.hbm %s1241_s4, %s664_s22  ;;  %s232_s27 = sshll.u32 %s224_s26, 4  ;;  %s233_s27 = int_to_ptr.vmem [resolvable:$true] %s232_s27 }
  0x17   : > { %s230_s28 = sshll.u32 %s228_s25, 4  ;;  %p1082_p8 = pnand %p689_p6, %p1062_p4  ;;  %s231_s28 = int_to_ptr.hbm [resolvable:$true] %s230_s28 }
  0x18   : > { %p667_p9 = scmp.ge.s32.totalorder %s954_s0, 1  ;;  %p256_p10 = scmp.lt.s32.totalorder %s954_s0, 3 }
  0x19   : > { %s221_s30 = scalar_lea.sflag [#allocation9], %s1073_s20  ;;  %s786_s9 = sshra.s32 %s231_s28, 4  ;;  %s787_s9 = int_to_ptr.hbm [resolvable:$true] %s786_s9 }
  0x1a   : > { %s788_s10 = scalar_lea.hbm %s787_s9, 8  ;;  %p790_p12 = pneg %p1082_p8 }
  0x1b   : > { %p789_p11 = scmp.ne.s32.totalorder %s787_s9, %s788_s10  ;;  %s793_s16 = scalar_lea.hbm %s1241_s4, 16 }
  0x1c   : > { %p794_p1 = scmp.lt.s32.totalorder %s787_s9, %s1241_s4  ;;  %p795_p2 = scmp.lt.s32.totalorder %s793_s16, %s788_s10 }
  0x1d   : > { %p791_p13 = pnand %p790_p12, %p789_p11 }
  0x1e   : > { %p796_p3 = por %p795_p2, %p794_p1 }
  0x1f   : > { %p792_p0 = pneg %p791_p13 }
  0x21   : > { %p797_p4 = pnand %p796_p3, %p792_p0 }
  0x23   : > { %800 = shalt.err (!%p797_p4)
}
  0x24   : > { %685 = dma.hbm_to_vmem [thread:$0]  (!%p1082_p8), %s231_s28, 128, %s233_s27, %s221_s30  }
  0x25   : > { %p1106_p5 = pnand %p667_p9, %p256_p10  ;;  %s247_s9 = scalar_lea.hbm %s1242_s5, %s664_s22 }
  0x26   : > { %s243_s10 = scalar_lea.vmem [#allocation10], %s663_s21  ;;  %s249_s15 = sshll.u32 %s247_s9, 4  ;;  %s250_s15 = int_to_ptr.hbm [resolvable:$true] %s249_s15 }
  0x27   : > { %s251_s11 = sshll.u32 %s243_s10, 4  ;;  %s240_s16 = scalar_lea.sflag [#allocation11], %s1073_s20  ;;  %s252_s11 = int_to_ptr.vmem [resolvable:$true] %s251_s11 }
  0x28   : > { %s816_s18 = sshra.s32 %s250_s15, 4  ;;  %s823_s28 = scalar_lea.hbm %s1242_s5, 16  ;;  %s817_s18 = int_to_ptr.hbm [resolvable:$true] %s816_s18 }
  0x29   : > { %s818_s23 = scalar_lea.hbm %s817_s18, 8  ;;  %p824_p11 = scmp.lt.s32.totalorder %s817_s18, %s1242_s5 }
  0x2a   : > { %p819_p6 = scmp.ne.s32.totalorder %s817_s18, %s818_s23  ;;  %p825_p13 = scmp.lt.s32.totalorder %s823_s28, %s818_s23 }
  0x2c   : > { %p821_p9 = pnand %p819_p6, %p790_p12  ;;  %p826_p0 = por %p825_p13, %p824_p11 }
  0x2e   : > { %p822_p10 = pneg %p821_p9 }
  0x30   : > { %p827_p1 = pnand %p826_p0, %p822_p10 }
  0x32   : > { %830 = shalt.err (!%p827_p1)
}
  0x33   : > { %688 = dma.hbm_to_vmem [thread:$0]  (!%p1082_p8), %s250_s15, 128, %s252_s11, %s240_s16  }
  0x34   : > { %260 = sbr.rel (%p1106_p5) target bundleno = 830 (0x33e), region = 40  ;;  %s262_s20 = sand.u32 (!%p1106_p5), 1, %s946_s12  }
  0x35   : > { %s668_s21 = sshll.u32 (!%p1106_p5), %s262_s20, 3  ;;  %s263_s25 = scalar_lea.sflag (!%p1106_p5), [#allocation9], %s262_s20 }
  0x36   : > { %s1128_s26 = scalar_lea.vmem (!%p1106_p5), [#allocation8], %s668_s21 }
  0x39   : > { %929 = dma.done.wait (%p1068_p7), %s263_s25, 128  }
  0x3a   : > { %931 = vsyncadd (%p1068_p7), %s263_s25, 4294967168  ;;  %s273_s9 = scalar_lea.sflag [#allocation11], %s262_s20  ;;  %s1134_s10 = scalar_lea.vmem [#allocation10], %s668_s21 }
  0x3b   : > { %933 = dma.done.wait (%p1068_p7), %s273_s9, 128  }
  0x3c   : > { %935 = vsyncadd (%p1068_p7), %s273_s9, 4294967168  ;;  %p315_p8 = scmp.lt.s32.totalorder %s1047_s1, 1  ;;  %s1252_s2 = sld [smem:[#allocation23_spill]] }
  0x3d   : > { %s1253_s3 = sld [smem:[#allocation24_spill]]  ;;  %s1160_s22 = smov 0  }
  0x3e   : > { %s1143_s24 = scalar_select %p315_p8, %s1047_s1, 1 }
  0x40   : > { %s670_s11 = sshll.u32 %s1143_s24, 3 }
  0x42   : > { %s1153_s27 = scalar_lea.vmem %s1252_s2, %s670_s11 }
  0x43   : > { %s1158_s30 = scalar_lea.vmem %s1253_s3, %s670_s11 }
  0x44 LB: >> { %s1254_s29 = sshll.u32 %s1047_s1, 3  ;;  %s336_s25 = scalar_lea.vmem [#allocation2], %s958_s22  ;;  %s958_s22 = sphi %s1160_s22, %s332_s22  }
  0x45   : >> { %s333_s20 = sadd.s32 %s958_s22, %s1254_s29  ;;  %s346_s9 = sshll.u32 %s336_s25, 4  ;;  %s347_s9 = int_to_ptr.vmem [resolvable:$true] %s346_s9 }
  0x46   : >> { %s334_s21 = sld [smem:[#allocation6 + %s333_s20]]  ;;  %s850_s2 = scalar_lea.hbm %s1243_s6, 64 }
  0x4c   : >> { %s335_s11 = scalar_lea.hbm %s1243_s6, %s334_s21 }
  0x4d   : >> { %s344_s23 = sshll.u32 %s335_s11, 4  ;;  %s345_s23 = int_to_ptr.hbm [resolvable:$true] %s344_s23 }
  0x4e   : >> { %s846_s0 = sshra.s32 %s345_s23, 4  ;;  %s847_s0 = int_to_ptr.hbm [resolvable:$true] %s846_s0 }
  0x4f   : >> { %s848_s19 = scalar_lea.hbm %s847_s0, 1  ;;  %p851_p12 = scmp.lt.s32.totalorder %s847_s0, %s1243_s6 }
  0x50   : >> { %p849_p7 = scmp.ne.s32.totalorder %s847_s0, %s848_s19  ;;  %p852_p2 = scmp.lt.s32.totalorder %s850_s2, %s848_s19 }
  0x52   : >> { %p853_p3 = por %p852_p2, %p851_p12 }
  0x54   : >> { %p854_p4 = pnand %p853_p3, %p849_p7 }
  0x56   : >> { %857 = shalt.err (!%p854_p4)  }
  0x57   : >> { %s858_s20 = sshra.s32 %s347_s9, 4  ;;  %s973_s25 = smov [#allocation2]   ;;  %s859_s20 = int_to_ptr.vmem [resolvable:$true] %s858_s20 }
  0x58   : >> { %s860_s21 = scalar_lea.vmem %s859_s20, 1  ;;  %s862_s15 = scalar_lea.vmem %s973_s25, 8 }
  0x59   : >> { %p861_p5 = scmp.ne.s32.totalorder %s859_s20, %s860_s21  ;;  %p863_p6 = scmp.lt.s32.totalorder %s859_s20, [#allocation2] }
  0x5a   : >> { %p864_p9 = scmp.lt.s32.totalorder %s862_s15, %s860_s21 }
  0x5c   : >> { %p865_p10 = por %p864_p9, %p863_p6 }
  0x5e   : >> { %p866_p11 = pnand %p865_p10, %p861_p5 }
  0x60   : >> { %869 = shalt.err (!%p866_p11)  }
  0x61   : >> { %349 = dma.hbm_to_vmem [thread:$0]  %s345_s23, 16, %s347_s9, [#allocation4] }
  0x62   : >> { %s332_s22 = sadd.s32 1, %s958_s22  }
  0x63   : >> { %p329_p13 = scmp.ge.s32.totalorder %s332_s22, 8  }
  0x64   : > { %v350_v0 = vld [vmem:[%s1153_s27] sm:$0xff] (%p329_p13)  ;;  %v974_v1 = vmov (%p329_p13), 0   ;;  %v353_v7 = vlaneseq (%p329_p13)  ;;  %v975_v10 = vmov (%p329_p13), 0.0   ;;  %s1186_s2 = sld [smem:[#allocation7]] (%p329_p13)  ;;  %s960_s3 = smov (%p329_p13), 0  }
  0x65   : > { %331 = sbr.rel (!%p329_p13) target bundleno = 68 (0x44), region = 142  ;;  %361 = vmax.xlane.f32.xlu0 (%p329_p13), %v350_v0  ;;  %v351_v2 = vld [vmem:[%s1158_s30] sm:$0xff] (%p329_p13) }
  0x66   : > { %757 = vset.pattern.permute.xlu0 (%p329_p13), %v974_v1  ;;  %v354_v8 = vand.u32 (%p329_p13), 127, %v353_v7 }
  0x79   : > { %356 = vperm.xlu0 %757, %v351_v2  }
  0xd8   : > { %v362_v3 = vpop.xlane.xlu0 %361 }
  0xd9   : > { %v363_v4 = vsub.f32 %v350_v0, %v362_v3 }
  0xdb   : > { %v364_v5 = vmul.f32 1.442695, %v363_v4 }
  0xdd   : > { %758 = vpow2.f32 %v364_v5 }
  0xe3   : > { %v759_v6 = vpop.eup %758 }
  0xe4   : > { %366 = vadd.xlane.f32.xlu1 %v759_v6 }
  0xeb   : > { %v357_v9 = vpop.permute.xlu0 %356 }
  0xec   : > { %vm358_vm0 = vcmp.eq.s32.totalorder %v354_v8, %v357_v9 }
  0xed   : > { %v1183_v11 = vsel %vm358_vm0, 1.0, %v975_v10 }
  0xee   : > { %v371_v12 = vmul.f32 %v1183_v11, %v350_v0 }
  0xf0   : > { %372 = vadd.xlane.f32.xlu1 %v371_v12 }
 0x157   : > { %v367_v13 = vpop.xlane.xlu1 %366 }
 0x158   : > { %760 = vlog2.f32 %v367_v13 }
 0x15e   : > { %v761_v14 = vpop.eup %760 }
 0x15f   : > { %v369_v15 = vmul.f32 0.6931472, %v761_v14 }
 0x161   : > { %v370_v16 = vadd.f32 %v369_v15, %v362_v3 }
 0x163   : > { %v373_v17 = vpop.xlane.xlu1 %372 }
 0x164   : > { %v374_v18 = vsub.f32 %v370_v16, %v373_v17 }
 0x166   : > { %v375_v19 = vrot.slane %v374_v18, 4 }
 0x168   : > { %v376_v20 = vadd.f32 %v375_v19, %v374_v18 }
 0x16a   : > { %v377_v21 = vrot.slane %v376_v20, 2 }
 0x16c   : > { %v378_v22 = vadd.f32 %v377_v21, %v376_v20 }
 0x16e   : > { %v379_v23 = vrot.slane %v378_v22, 1 }
 0x170   : > { %v380_v24 = vadd.f32 %v379_v23, %v378_v22 }
 0x172   : > { %v1188_v25 = vmul.f32 0.0625, %v380_v24 }
 0x173 LB: >> { %936 = dma.done.wait [#allocation4], 16  ;;  %s962_s3 = sphi %s960_s3, %s387_s3  }
 0x174   : >> { %937 = vsyncadd [#allocation4], 4294967280  ;;  %s387_s3 = sadd.s32 1, %s962_s3  }
 0x175   : >> { %p384_p0 = scmp.ge.s32.totalorder %s387_s3, 8  }
 0x176   : > { %v391_v26 = vld [vmem:[#allocation2] sm:$0xff] (%p384_p0)  ;;  %v393_v27 = vmul.f32 (%p384_p0), 0.3, %v350_v0  ;;  %s1190_s29 = smov (%p384_p0), 0  }
 0x177   : > { %386 = sbr.rel (!%p384_p0) target bundleno = 371 (0x173), region = 153  ;;  %v392_v28 = vmul.f32 (%p384_p0), 0.7, %v391_v26 }
 0x179   : > { %v394_v29 = vadd.f32 (%p384_p0), %v393_v27, %v392_v28 }
 0x17b   : > { %395 = vst [vmem:[#allocation3] sm:$0xff] (%p384_p0), %v394_v29 }
 0x17c LB: >> { %s1255_s18 = sshll.u32 %s1047_s1, 3  ;;  %s404_s22 = scalar_lea.vmem [#allocation3], %s966_s29  ;;  %s966_s29 = sphi %s1190_s29, %s401_s29  }
 0x17d   : >> { %s402_s27 = sadd.s32 %s966_s29, %s1255_s18  ;;  %s414_s9 = sshll.u32 %s404_s22, 4  ;;  %s415_s9 = int_to_ptr.vmem [resolvable:$true] %s414_s9 }
 0x17e   : >> { %s403_s30 = sld [smem:[#allocation6 + %s402_s27]]  ;;  %s870_s19 = sshra.s32 %s415_s9, 4  ;;  %s871_s19 = int_to_ptr.vmem [resolvable:$true] %s870_s19 }
 0x17f   : >> { %s872_s28 = scalar_lea.vmem %s871_s19, 1  ;;  %s976_s20 = smov [#allocation3]  }
 0x180   : >> { %p873_p1 = scmp.ne.s32.totalorder %s871_s19, %s872_s28  ;;  %s874_s21 = scalar_lea.vmem %s976_s20, 8 }
 0x181   : >> { %p875_p8 = scmp.lt.s32.totalorder %s871_s19, [#allocation3]  ;;  %p876_p7 = scmp.lt.s32.totalorder %s874_s21, %s872_s28 }
 0x183   : >> { %p877_p12 = por %p876_p7, %p875_p8 }
 0x184   : >> { %s405_s23 = scalar_lea.hbm %s1245_s8, %s403_s30 }
 0x185   : >> { %s416_s0 = sshll.u32 %s405_s23, 4  ;;  %p878_p2 = pnand %p877_p12, %p873_p1  ;;  %s417_s0 = int_to_ptr.hbm [resolvable:$true] %s416_s0 }
 0x187   : >> { %881 = shalt.err (!%p878_p2)  }
 0x188   : >> { %s882_s25 = sshra.s32 %s417_s0, 4  ;;  %s886_s27 = scalar_lea.hbm %s1245_s8, 64  ;;  %s883_s25 = int_to_ptr.hbm [resolvable:$true] %s882_s25 }
 0x189   : >> { %s884_s15 = scalar_lea.hbm %s883_s25, 1  ;;  %p887_p4 = scmp.lt.s32.totalorder %s883_s25, %s1245_s8 }
 0x18a   : >> { %p885_p3 = scmp.ne.s32.totalorder %s883_s25, %s884_s15  ;;  %p888_p5 = scmp.lt.s32.totalorder %s886_s27, %s884_s15 }
 0x18c   : >> { %p889_p6 = por %p888_p5, %p887_p4 }
 0x18e   : >> { %p890_p9 = pnand %p889_p6, %p885_p3 }
 0x190   : >> { %893 = shalt.err (!%p890_p9)  }
 0x191   : >> { %419 = dma.vmem_to_hbm [thread:$0]  %s415_s9, 16, %s417_s0, [#allocation4 + $0x1] }
 0x192   : >> { %s401_s29 = sadd.s32 1, %s966_s29  }
 0x193   : >> { %p398_p10 = scmp.ge.s32.totalorder %s401_s29, 8  }
 0x194   : > { %v457_v30 = vld [vmem:[%s1128_s26] sm:$0xff] (%p398_p10)  ;;  %v420_v31 = vmul.f32 (%p398_p10), 3.030303, %v394_v29  ;;  %v481_v32 = vld [vmem:[%s1134_s10] sm:$0xff] (%p398_p10)  ;;  %s448_s1 = ssub.f32 (%p398_p10), 1.0, %s1186_s2  ;;  %v446_v57 = vstv (%p398_p10), %s1186_s2  ;;  %v454_v0 = vsub.f32 (%p398_p10), 1.0, %v1183_v11  ;;  %s1256_s2 = scalar_lea.vmem (%p398_p10), %s1244_s7, %s1143_s24 }
 0x195   : > { %400 = sbr.rel (!%p398_p10) target bundleno = 380 (0x17c), region = 164  ;;  %458 = vmax.xlane.f32.xlu1 (%p398_p10), %v457_v30  ;;  %vm505_vm5 = vcmask (%p398_p10), 0   ;;  %s968_s29 = smov (%p398_p10), 0  }
 0x196   : > { %421 = vmax.xlane.f32.xlu0 (%p398_p10), %v420_v31  ;;  %v449_v60 = vstv (%p398_p10), %s448_s1 }
 0x19d   : > { %482 = vmax.xlane.f32.xlu1 %v481_v32 }
 0x208   : > { %v459_v33 = vpop.xlane.xlu1 %458 }
 0x209   : > { %v422_v34 = vpop.xlane.xlu0 %421  ;;  %v460_v37 = vsub.f32 %v457_v30, %v459_v33 }
 0x20a   : > { %v423_v35 = vsub.f32 %v420_v31, %v422_v34 }
 0x20b   : > { %v461_v40 = vmul.f32 1.442695, %v460_v37 }
 0x20c   : > { %v424_v36 = vmul.f32 1.442695, %v423_v35 }
 0x20e   : > { %762 = vpow2.f32 %v424_v36 }
 0x210   : > { %v483_v38 = vpop.xlane.xlu1 %482 }
 0x211   : > { %v484_v39 = vsub.f32 %v481_v32, %v483_v38 }
 0x213   : > { %v485_v41 = vmul.f32 1.442695, %v484_v39 }
 0x214   : > { %v763_v42 = vpop.eup %762 }
 0x215   : > { %764 = vpow2.f32 %v485_v41  ;;  %426 = vadd.xlane.f32.xlu0 %v763_v42  ;;  %v428_v43 = vmul.f32 %v763_v42, %v1183_v11 }
 0x216   : > { %766 = vpow2.f32 %v461_v40 }
 0x217   : > { %429 = vadd.xlane.f32.xlu2 %v428_v43 }
 0x21b   : > { %v765_v44 = vpop.eup %764 }
 0x21c   : > { %v767_v45 = vpop.eup %766 }
 0x21d   : > { %487 = vadd.xlane.f32.xlu0 %v765_v44 }
 0x21f   : > { %463 = vadd.xlane.f32.xlu2 %v767_v45 }
 0x288   : > { %v427_v46 = vpop.xlane.xlu0 %426 }
 0x289   : > { %768 = vrcp.f32 %v427_v46  ;;  %v442_v50 = vand.u32 2147483648, %v427_v46  ;;  %v440_v52 = vand.u32 2147483647, %v427_v46  ;;  %vm436_vm2 = vweird.f32 %v427_v46 }
 0x28a   : > { %v430_v58 = vpop.xlane.xlu2 %429 }
 0x28b   : > { %v443_v54 = vor.u32 1.1754944e-38, %v442_v50  ;;  %vm441_vm4 = vcmp.eq.f32.partialorder %v440_v52, 8.507059e+37 }
 0x28f   : > { %v769_v47 = vpop.eup %768 }
 0x290   : > { %v432_v48 = vmul.f32 %v769_v47, %v427_v46  ;;  %vm437_vm1 = vweird.f32 %v769_v47  ;;  %v488_v7 = vpop.xlane.xlu0 %487 }
 0x291   : > { %vm438_vm3 = vmor %vm436_vm2, %vm437_vm1  ;;  %770 = vlog2.f32 %v488_v7 }
 0x292   : > { %v433_v49 = vsub.f32 1.0, %v432_v48  ;;  %v464_v8 = vpop.xlane.xlu2 %463 }
 0x293   : > { %772 = vlog2.f32 %v464_v8 }
 0x294   : > { %v434_v51 = vmul.f32 %v769_v47, %v433_v49 }
 0x296   : > { %v435_v53 = vadd.f32 %v769_v47, %v434_v51 }
 0x297   : > { %v771_v9 = vpop.eup %770 }
 0x298   : > { %v439_v55 = vsel %vm438_vm3, %v769_v47, %v435_v53  ;;  %v490_v12 = vmul.f32 0.6931472, %v771_v9 }
 0x299   : > { %v444_v56 = vsel %vm441_vm4, %v443_v54, %v439_v55  ;;  %v773_v10 = vpop.eup %772 }
 0x29a   : > { %v445_v59 = vmul.f32 %v444_v56, %v430_v58  ;;  %v466_v13 = vmul.f32 0.6931472, %v773_v10  ;;  %v491_v15 = vadd.f32 %v490_v12, %v483_v38 }
 0x29c   : > { %v447_v61 = vmul.f32 %v446_v57, %v445_v59  ;;  %v467_v14 = vadd.f32 %v466_v13, %v459_v33 }
 0x29e   : > { %v450_v62 = vadd.f32 %v449_v60, %v447_v61 }
 0x2a0   : > { %v451_v63 = vsub.f32 1.0, %v450_v62  ;;  %v453_v2 = vmul.f32 %v1183_v11, %v450_v62 }
 0x2a2   : > { %v452_v1 = vmul.f32 0.007874016, %v451_v63 }
 0x2a4   : > { %v455_v3 = vmul.f32 %v454_v0, %v452_v1 }
 0x2a6   : > { %v456_v4 = vadd.f32 %v455_v3, %v453_v2 }
 0x2a8   : > { %v492_v5 = vmul.f32 %v481_v32, %v456_v4  ;;  %v468_v6 = vmul.f32 %v457_v30, %v456_v4 }
 0x2aa   : > { %493 = vadd.xlane.f32.xlu2 %v492_v5  ;;  %469 = vadd.xlane.f32.xlu1 %v468_v6 }
 0x31d   : > { %v470_v16 = vpop.xlane.xlu1 %469  ;;  %v494_v17 = vpop.xlane.xlu2 %493 }
 0x31e   : > { %v471_v18 = vsub.f32 %v467_v14, %v470_v16  ;;  %v495_v11 = vsub.f32 %v491_v15, %v494_v17 }
 0x320   : > { %v472_v19 = vrot.slane %v471_v18, 4  ;;  %v496_v20 = vrot.slane %v495_v11, 4 }
 0x322   : > { %v473_v21 = vadd.f32 %v472_v19, %v471_v18  ;;  %v497_v22 = vadd.f32 %v496_v20, %v495_v11 }
 0x324   : > { %v474_v23 = vrot.slane %v473_v21, 2  ;;  %v498_v24 = vrot.slane %v497_v22, 2 }
 0x326   : > { %v475_v26 = vadd.f32 %v474_v23, %v473_v21  ;;  %v499_v27 = vadd.f32 %v498_v24, %v497_v22 }
 0x328   : > { %v476_v28 = vrot.slane %v475_v26, 1  ;;  %v500_v29 = vrot.slane %v499_v27, 1 }
 0x32a   : > { %v477_v30 = vadd.f32 %v476_v28, %v475_v26  ;;  %v501_v31 = vadd.f32 %v500_v29, %v499_v27 }
 0x32c   : > { %v478_v32 = vmul.f32 0.0625, %v477_v30  ;;  %v502_v33 = vmul.f32 0.0625, %v501_v31 }
 0x32e   : > { %v479_v34 = vmul.f32 2.0, %v478_v32  ;;  %v503_v36 = vmul.f32 2.0, %v502_v33 }
 0x330   : > { %v480_v35 = vadd.f32 %v479_v34, %v1188_v25 }
 0x332   : > { %v504_v37 = vadd.f32 %v503_v36, %v480_v35 }
 0x334   : > { %506 = vst.msk [vmem:[%s1256_s2] sm:$0x1] %vm505_vm5, %v504_v37 }
 0x335 LB: >> { %938 = dma.done.wait [#allocation4 + $0x1], 16  ;;  %s970_s29 = sphi %s968_s29, %s512_s29  }
 0x336   : >> { %939 = vsyncadd [#allocation4 + $0x1], 4294967280  ;;  %s512_s29 = sadd.s32 1, %s970_s29  }
 0x337   : >> { %p509_p11 = scmp.ge.s32.totalorder %s512_s29, 8  }
 0x339   : > { %511 = sbr.rel (!%p509_p11) target bundleno = 821 (0x335), region = 175 }
 0x33e PF: > { %p31_p13 = scmp.ge.s32.totalorder %s1050_s14, 4   ;;  %s1257_s11 = smov %s946_s12 }
 0x33f   : > { %s1258_s12 = smov %s950_s13  ;;  %s1259_s13 = smov %s1060_s17 }
 0x340   : > { %s1260_s0 = smov %s1050_s14  ;;  %33 = sbr.rel (!%p31_p13) target bundleno = 13 (0xd), region = 186 }
 0x345   :  { %534 = vsyncpa [#allocation9], 1 }
 0x346   :  { %536 = vsyncpa [#allocation9 + $0x1], 1 }
 0x347   :  { %537 = vsyncpa [#allocation11], 1 }
 0x348   :  { %539 = vsyncpa [#allocation11 + $0x1], 1 }
 0x349   :  { %540 = vsyncmov [#allocation4] }
 0x34c   :  { %s541_s24 = vpop.sfrf %540 }
 0x34d   :  { %p676_p0 = scmp.ne.s32.totalorder %s541_s24, 0 }
 0x34f   :  { %545 = shalt.err (%p676_p0)  }
 0x350   :  { %547 = vsyncmov [#allocation4 + $0x1] }
 0x353   :  { %s548_s9 = vpop.sfrf %547 }
 0x354   :  { %p677_p1 = scmp.ne.s32.totalorder %s548_s9, 0 }
 0x356   :  { %552 = shalt.err (%p677_p1)  }

</bundles_post_ra>
